<compile_context>
chip_gen: v5e
topology: v5e:2x2
jax: 0.10.0
libtpu: 0.0.40
codegen_flags: <defaults>
</compile_context>

<pallas_src>
import functools

import jax
import jax.numpy as jnp
from jax import lax
from jax.experimental import pallas as pl
from jax.experimental.pallas import tpu as pltpu


# dot_general dims for A(m,k) x B(n,k) -> (m,n): contract the last dim of both
# (the standard "q @ k^T" pattern, natively supported by the MXU lowering).
_TRANS_B = (((1,), (1,)), ((), ()))


def _softmax_row(x):
    """Numerically stable softmax over the last (lane) axis of a (1, S) row."""
    m = jnp.max(x, axis=-1, keepdims=True)
    e = jnp.exp(x - m)
    return e / jnp.sum(e, axis=-1, keepdims=True)


# ----------------------------------------------------------------------------- kernels
# All kernels receive:
#   h_ref : (B, H)          decoder hidden state (leading 1 squeezed in wrapper)
#   e_ref : (S*B, H)        encoder outputs, row s*B + b == encoder_outputs[s, b]
#   o_ref : (B, 1, S)       softmax attention weights (written directly)
# The batch loop is a static Python unroll (B is tiny); each iteration is pure
# 2-D trans-B matmuls + lane-axis softmax -- no in-kernel transposes or reshapes.


def dot_kernel(h_ref, e_ref, o_ref):
    B, _, S = o_ref.shape
    for b in range(B):
        hb = h_ref[b:b + 1, :]                                  # (1, H)
        eb = e_ref[pl.ds(b, S, stride=B), :]                    # (S, H) = enc[:, b, :]
        s = lax.dot_general(hb, eb, _TRANS_B,
                            preferred_element_type=jnp.float32)  # (1, S)
        o_ref[b] = _softmax_row(s).astype(o_ref.dtype)


def general_kernel(h_ref, e_ref, w_ref, b_ref, o_ref):
    # nn.Linear: energy = e @ W^T + bias ;  score = h . energy
    # Folded:    score[b,s] = (h_b @ W) . e[s,b]  +  h_b . bias
    B, _, S = o_ref.shape
    w = w_ref[...]                                              # (H_out, H_in), native layout
    bias = b_ref[...]                                           # (1, H_out)
    for b in range(B):
        hb = h_ref[b:b + 1, :]                                  # (1, H_out)
        u = jnp.dot(hb, w, preferred_element_type=jnp.float32)  # (1, H_in)
        c = jnp.sum(hb * bias, axis=-1, keepdims=True)          # (1, 1)
        eb = e_ref[pl.ds(b, S, stride=B), :]                    # (S, H_in)
        s = lax.dot_general(u, eb, _TRANS_B,
                            preferred_element_type=jnp.float32) + c   # (1, S)
        o_ref[b] = _softmax_row(s).astype(o_ref.dtype)


def concat_kernel(h_ref, e_ref, w_ref, bv_ref, o_ref):
    # energy = tanh([h | e] @ W^T + bias) = tanh(h @ W_h^T + e @ W_e^T + bias)
    # w_ref : (2, H, H) = [W_h, W_e] (each (out, in)), pre-split once at init.
    # bv_ref: (2, H)    = [bias, v], packed once at init.
    B, _, S = o_ref.shape
    wh = w_ref[0]                                               # (H_out, H_in)
    we = w_ref[1]                                               # (H_out, H_in)
    bias = bv_ref[0:1, :]                                       # (1, H_out)
    v = bv_ref[1:2, :]                                          # (1, H_out)
    for b in range(B):
        hb = h_ref[b:b + 1, :]                                  # (1, H)
        hc = lax.dot_general(hb, wh, _TRANS_B,
                             preferred_element_type=jnp.float32) + bias   # (1, H_out)
        eb = e_ref[pl.ds(b, S, stride=B), :]                    # (S, H)
        ew = lax.dot_general(eb, we, _TRANS_B,
                             preferred_element_type=jnp.float32)          # (S, H_out)
        energy = jnp.tanh(ew + hc)                              # (S, H_out)
        s = lax.dot_general(v, energy, _TRANS_B,
                            preferred_element_type=jnp.float32)           # (1, S)
        o_ref[b] = _softmax_row(s).astype(o_ref.dtype)


# ----------------------------------------------------------------------------- wrappers

_VMEM = pl.BlockSpec(memory_space=pltpu.MemorySpace.VMEM)


def _cost(method, B, S, H, args):
    bytes_accessed = sum(a.size * a.dtype.itemsize for a in args) + B * S * 4
    if method == "dot":
        flops, trans = 2 * B * S * H, B * S
    elif method == "general":
        flops, trans = 2 * B * H * H + 2 * B * S * H + 2 * B * H, B * S
    else:  # concat
        flops, trans = 2 * B * H * H + 2 * B * S * H * H + 2 * B * S * H, B * S + B * S * H
    return pl.CostEstimate(flops=flops, transcendentals=trans,
                           bytes_accessed=bytes_accessed)


def _call(kernel, out_shape, cost, *args):
    return pl.pallas_call(
        kernel,
        out_shape=jax.ShapeDtypeStruct(out_shape, jnp.float32),
        in_specs=[_VMEM] * len(args),
        out_specs=_VMEM,
        cost_estimate=cost,
    )(*args)


def pack_concat_params(attn_w, attn_b, v):
    """One-time (init) packing of 'concat' params into kernel-friendly form."""
    H = attn_w.shape[0]
    return {
        "attn_w": attn_w, "attn_b": attn_b, "v": v,                       # reference forms
        "attn_w_split": jnp.stack([attn_w[:, :H], attn_w[:, H:]], axis=0),  # (2, H, H)
        "attn_bv": jnp.concatenate([attn_b, v], axis=0),                    # (2, H)
    }


@functools.partial(jax.jit, static_argnames=("method",))
def attn_forward(method, hidden, encoder_outputs, params):
    """Pallas equivalent of Attn.forward. Returns (B, 1, S) attention weights."""
    S, B, H = encoder_outputs.shape
    # Contiguous (bitcast) reshapes only -- no transposes, no extra HBM traffic.
    h2d = hidden.reshape(B, H)                       # (B, H)
    e2d = encoder_outputs.reshape(S * B, H)          # row s*B + b == enc[s, b]

    if method == "dot":
        kernel, args = dot_kernel, (h2d, e2d)
    elif method == "general":
        kernel, args = general_kernel, (h2d, e2d, params["attn_w"], params["attn_b"])
    elif method == "concat":
        kernel, args = concat_kernel, (h2d, e2d, params["attn_w_split"], params["attn_bv"])
    else:
        raise ValueError(method, "is not an appropriate attention method.")

    return _call(kernel, (B, 1, S), _cost(method, B, S, H, args), *args)


# ----------------------------------------------------------------------------- reference


def attn_reference(method, hidden, encoder_outputs, params):
    """Pure-JAX mirror of the PyTorch module (seq-major, unfused)."""
    h = hidden[0]                                                # (B, H)
    if method == "dot":
        scores = jnp.sum(h[None] * encoder_outputs, axis=2)
    elif method == "general":
        energy = encoder_outputs @ params["attn_w"].T + params["attn_b"][0]
        scores = jnp.sum(h[None] * energy, axis=2)
    elif method == "concat":
        cat = jnp.concatenate(
            [jnp.broadcast_to(h[None], encoder_outputs.shape), encoder_outputs], axis=2)
        energy = jnp.tanh(cat @ params["attn_w"].T + params["attn_b"][0])
        scores = jnp.sum(params["v"][0] * energy, axis=2)
    att = jax.nn.softmax(scores.T, axis=1)                       # (B, S)
    return att[:, None, :]                                       # (B, 1, S)


# ----------------------------------------------------------------------------- main

if __name__ == "__main__":
    B, S, H = 2, 8, 32
    key = jax.random.PRNGKey(0)
    k_h, k_e, k_wg, k_bg, k_wc, k_bc, k_v = jax.random.split(key, 7)

    hidden = jax.random.normal(k_h, (1, B, H), dtype=jnp.float32)
    encoder_outputs = jax.random.normal(k_e, (S, B, H), dtype=jnp.float32)

    # Synthetic parameters; shapes follow nn.Linear in __init__ (W stored (out, in)).
    params_general = {
        "attn_w": jax.random.normal(k_wg, (H, H), dtype=jnp.float32) * 0.1,
        "attn_b": jax.random.normal(k_bg, (1, H), dtype=jnp.float32) * 0.1,
    }
    params_concat = pack_concat_params(
        jax.random.normal(k_wc, (H, 2 * H), dtype=jnp.float32) * 0.1,
        jax.random.normal(k_bc, (1, H), dtype=jnp.float32) * 0.1,
        jax.random.normal(k_v, (1, H), dtype=jnp.float32) * 0.1,
    )

    all_ok = True
    for method, params in (("dot", {}), ("general", params_general),
                           ("concat", params_concat)):
        out = attn_forward(method, hidden, encoder_outputs, params)
        out = jax.block_until_ready(out)
        ref = attn_reference(method, hidden, encoder_outputs, params)
        assert out.shape == (B, 1, S), (method, out.shape)
        if not jnp.allclose(out, ref, atol=1e-5, rtol=1e-4):
            all_ok = False
            print(f"MISMATCH in method={method}: max_err="
                  f"{float(jnp.max(jnp.abs(out - ref)))}")

    if all_ok:
        print("KERNEL_OK")
</pallas_src>

<mosaic_0001>
module attributes {stable_mosaic.version = 11 : i64} {
  func.func @dot_kernel(%arg0: memref<2x32xf32, #tpu.memory_space<vmem>>, %arg1: memref<16x32xf32, #tpu.memory_space<vmem>>, %arg2: memref<2x1x8xf32, #tpu.memory_space<vmem>>) attributes {dimension_semantics = [], scalar_prefetch = 0 : i64, scratch_operands = 0 : i64, tpu.core_type = #tpu.core_type<tc>} {
    %c0 = arith.constant 0 : index
    %c0_0 = arith.constant 0 : index
    %0 = vector.load %arg0[%c0, %c0_0] : memref<2x32xf32, #tpu.memory_space<vmem>>, vector<1x32xf32>
    %c0_1 = arith.constant 0 : index
    %c0_2 = arith.constant 0 : index
    %1 = tpu.strided_load %arg1[%c0_1, %c0_2] {strides = array<i32: 2, 1>} : memref<16x32xf32, #tpu.memory_space<vmem>>, vector<8x32xf32>
    %cst = arith.constant dense<0.000000e+00> : vector<1x8xf32>
    %2 = tpu.matmul %0, %1, %cst {dimension_numbers = #tpu.dot_dimension_numbers<[1], [1], [0], [0], [0, 0, 1, 0], [], []>} : vector<1x32xf32>, vector<8x32xf32>, vector<1x8xf32> -> vector<1x8xf32>
    %cst_3 = arith.constant dense<0xFF800000> : vector<1xf32>
    %3 = vector.multi_reduction <maximumf>, %2, %cst_3 [1] : vector<1x8xf32> to vector<1xf32>
    %4 = vector.shape_cast %3 : vector<1xf32> to vector<1x1xf32>
    %5 = vector.broadcast %4 : vector<1x1xf32> to vector<1x8xf32>
    %6 = arith.subf %2, %5 : vector<1x8xf32>
    %7 = math.exp %6 : vector<1x8xf32>
    %cst_4 = arith.constant dense<0.000000e+00> : vector<1xf32>
    %8 = vector.multi_reduction <add>, %7, %cst_4 [1] : vector<1x8xf32> to vector<1xf32>
    %9 = vector.shape_cast %8 : vector<1xf32> to vector<1x1xf32>
    %10 = vector.broadcast %9 : vector<1x1xf32> to vector<1x8xf32>
    %11 = arith.divf %7, %10 : vector<1x8xf32>
    %c0_5 = arith.constant 0 : index
    %c0_6 = arith.constant 0 : index
    %c0_7 = arith.constant 0 : index
    %12 = vector.load %arg2[%c0_5, %c0_6, %c0_7] : memref<2x1x8xf32, #tpu.memory_space<vmem>>, vector<1x1x8xf32>
    %13 = vector.shape_cast %12 : vector<1x1x8xf32> to vector<1x8xf32>
    %14 = vector.shape_cast %11 : vector<1x8xf32> to vector<1x1x8xf32>
    tpu.vector_store %arg2[%c0_5, %c0_6, %c0_7], %14 {strides = array<i32>} : memref<2x1x8xf32, #tpu.memory_space<vmem>>, vector<1x1x8xf32>,
    %c1 = arith.constant 1 : index
    %c0_8 = arith.constant 0 : index
    %15 = vector.load %arg0[%c1, %c0_8] : memref<2x32xf32, #tpu.memory_space<vmem>>, vector<1x32xf32>
    %c1_9 = arith.constant 1 : index
    %c0_10 = arith.constant 0 : index
    %16 = tpu.strided_load %arg1[%c1_9, %c0_10] {strides = array<i32: 2, 1>} : memref<16x32xf32, #tpu.memory_space<vmem>>, vector<8x32xf32>
    %cst_11 = arith.constant dense<0.000000e+00> : vector<1x8xf32>
    %17 = tpu.matmul %15, %16, %cst_11 {dimension_numbers = #tpu.dot_dimension_numbers<[1], [1], [0], [0], [0, 0, 1, 0], [], []>} : vector<1x32xf32>, vector<8x32xf32>, vector<1x8xf32> -> vector<1x8xf32>
    %cst_12 = arith.constant dense<0xFF800000> : vector<1xf32>
    %18 = vector.multi_reduction <maximumf>, %17, %cst_12 [1] : vector<1x8xf32> to vector<1xf32>
    %19 = vector.shape_cast %18 : vector<1xf32> to vector<1x1xf32>
    %20 = vector.broadcast %19 : vector<1x1xf32> to vector<1x8xf32>
    %21 = arith.subf %17, %20 : vector<1x8xf32>
    %22 = math.exp %21 : vector<1x8xf32>
    %cst_13 = arith.constant dense<0.000000e+00> : vector<1xf32>
    %23 = vector.multi_reduction <add>, %22, %cst_13 [1] : vector<1x8xf32> to vector<1xf32>
    %24 = vector.shape_cast %23 : vector<1xf32> to vector<1x1xf32>
    %25 = vector.broadcast %24 : vector<1x1xf32> to vector<1x8xf32>
    %26 = arith.divf %22, %25 : vector<1x8xf32>
    %c1_14 = arith.constant 1 : index
    %c0_15 = arith.constant 0 : index
    %c0_16 = arith.constant 0 : index
    %27 = vector.load %arg2[%c1_14, %c0_15, %c0_16] : memref<2x1x8xf32, #tpu.memory_space<vmem>>, vector<1x1x8xf32>
    %28 = vector.shape_cast %27 : vector<1x1x8xf32> to vector<1x8xf32>
    %29 = vector.shape_cast %26 : vector<1x8xf32> to vector<1x1x8xf32>
    tpu.vector_store %arg2[%c1_14, %c0_15, %c0_16], %29 {strides = array<i32>} : memref<2x1x8xf32, #tpu.memory_space<vmem>>, vector<1x1x8xf32>,
    return
  }
}

</mosaic_0001>

<bundles_post_ra>
// kernel: attn_forward.1
= control target key start
LH: loop header
LB: loop body
LE: loop exit
PB: predicated region body
PF: predicated region fallthrough
CT: control target
= control target key end

     0   :  { %7 = vsyncpa [#allocation3], 0  ;;  %s306_s0 = inlined_call_operand.hbm [shape: f32[2,32], index: 0, kind: input, shape index: {}]   ;;  %s307_s1 = inlined_call_operand.hbm [shape: f32[16,32], index: 1, kind: input, shape index: {}]   ;;  %s308_s2 = inlined_call_operand.hbm [shape: f32[2,1,8], index: 2, kind: output, shape index: {}]  }
   0x1   :  { %8 = vsyncpa [#allocation6], 0 }
   0x2   :  { %9 = vsyncpa [#allocation4], 0  ;;  %s15_s11 = sshll.u32 %s306_s0, 4  ;;  %s269_s12 = smov [#allocation2]   ;;  %s16_s11 = int_to_ptr.hbm [resolvable:$true] %s15_s11 }
   0x3   :  { %s17_s13 = sshll.u32 %s269_s12, 4  ;;  %s25_s16 = sshll.u32 %s307_s1, 4  ;;  %s18_s13 = int_to_ptr.vmem [resolvable:$true] %s17_s13  ;;  %s26_s16 = int_to_ptr.hbm [resolvable:$true] %s25_s16 }
   0x4   :  { %20 = dma.hbm_to_vmem [thread:$0]  %s16_s11, 32, %s18_s13, [#allocation3]  }
   0x5   :  { %s270_s17 = smov [#allocation5]   ;;  %s271_s19 = smov 128  }
   0x6   :  { %s27_s18 = sshll.u32 %s270_s17, 4  ;;  %s272_s20 = smov 8   ;;  %s28_s18 = int_to_ptr.vmem [resolvable:$true] %s27_s18 }
   0x7   :  { %33 = dma.hbm_to_vmem [thread:$0]  %s26_s16, 256, %s28_s18, [#allocation6], %s271_s19, %s271_s19, %s272_s20  }
   0x8   :  { %263 = dma.done.wait [#allocation3], 32  }
   0x9   :  { %264 = vsyncadd [#allocation3], 4294967264 }
   0xa   :  { %265 = dma.done.wait [#allocation6], 256  }
   0xb   :  { %266 = vsyncadd [#allocation6], 4294967040  ;;  %vm44_vm0 = vcmask 261120   ;;  %v43_v0 = vld [vmem:[#allocation5] ss:$2 sm:$0xff]  ;;  %vm71_vm1 = vcmask 57344  }
   0xc   :  { %v99_v1 = vld [vmem:[#allocation5 + $0x1] ss:$2 sm:$0xff]  ;;  %172 = vmatpush.xpose.msk.msra.mxu0 %vm44_vm0, %v43_v0  ;;  %v42_v2 = vld [vmem:[#allocation2] sm:$0x1]  ;;  %v97_v3 = vld [vmem:[#allocation2 + $0x1] sm:$0x1] }
   0xd   :  { %174 = vmatpush.xpose.msk.msra.mxu1 %vm44_vm0, %v99_v1  ;;  %s273_s0 = smov [#allocation7]   ;;  %s158_s23 = sshll.u32 %s308_s2, 4  ;;  %s159_s23 = int_to_ptr.hbm [resolvable:$true] %s158_s23 }
   0xe   :  { %s156_s1 = sshll.u32 %s273_s0, 4  ;;  %s274_s24 = smov 16   ;;  %s157_s1 = int_to_ptr.vmem [resolvable:$true] %s156_s1 }
   0xf   :  { %173 = vmatmul.msk.f32.vlgmr.msra.gmra.mxu0 %vm44_vm0, %v42_v2  ;;  %s275_s25 = smov 1  }
  0x10   :  { %175 = vmatmul.msk.f32.vlgmr.msra.gmra.mxu1 %vm44_vm0, %v97_v3 }
  0x8c   :  { %v68_v4 = vpop.f32.mrf.mxu0 }
  0x8d   :  { %v72_v5 = vsel %vm71_vm1, %v68_v4, -inf  ;;  %v123_v6 = vpop.f32.mrf.mxu1 }
  0x8e   :  { %73 = vmax.xlane.f32.xlu0 %v72_v5  ;;  %v126_v7 = vsel %vm71_vm1, %v123_v6, -inf }
  0x96   :  { %127 = vmax.xlane.f32.xlu0 %v126_v7 }
 0x101   :  { %v74_v8 = vpop.xlane.xlu0 %73 }
 0x102   :  { %v75_v9 = vsub.f32 %v68_v4, %v74_v8 }
 0x104   :  { %v76_v10 = vmul.f32 1.442695, %v75_v9 }
 0x106   :  { %183 = vpow2.f32 %v76_v10 }
 0x109   :  { %v128_v11 = vpop.xlane.xlu0 %127 }
 0x10a   :  { %v129_v12 = vsub.f32 %v123_v6, %v128_v11 }
 0x10c   :  { %v184_v13 = vpop.eup %183  ;;  %v130_v14 = vmul.f32 1.442695, %v129_v12 }
 0x10d   :  { %v78_v15 = vsel %vm71_vm1, %v184_v13, 0.0 }
 0x10e   :  { %185 = vpow2.f32 %v130_v14  ;;  %79 = vadd.xlane.f32.xlu1 %v78_v15 }
 0x114   :  { %v186_v16 = vpop.eup %185 }
 0x115   :  { %v132_v17 = vsel %vm71_vm1, %v186_v16, 0.0 }
 0x116   :  { %133 = vadd.xlane.f32.xlu1 %v132_v17 }
 0x181   :  { %v80_v18 = vpop.xlane.xlu1 %79 }
 0x182   :  { %187 = vrcp.f32 %v80_v18  ;;  %v92_v23 = vand.u32 2147483648, %v80_v18  ;;  %v90_v25 = vand.u32 2147483647, %v80_v18  ;;  %vm86_vm3 = vweird.f32 %v80_v18 }
 0x184   :  { %v93_v28 = vor.u32 1.1754944e-38, %v92_v23  ;;  %vm91_vm5 = vcmp.eq.f32.partialorder %v90_v25, 8.507059e+37 }
 0x188   :  { %v188_v19 = vpop.eup %187 }
 0x189   :  { %v82_v20 = vmul.f32 %v188_v19, %v80_v18  ;;  %v134_v21 = vpop.xlane.xlu1 %133  ;;  %vm87_vm2 = vweird.f32 %v188_v19 }
 0x18a   :  { %189 = vrcp.f32 %v134_v21  ;;  %vm88_vm4 = vmor %vm86_vm3, %vm87_vm2  ;;  %v146_v34 = vand.u32 2147483648, %v134_v21  ;;  %v144_v36 = vand.u32 2147483647, %v134_v21  ;;  %vm140_vm7 = vweird.f32 %v134_v21 }
 0x18b   :  { %v83_v22 = vsub.f32 1.0, %v82_v20 }
 0x18c   :  { %v147_v38 = vor.u32 1.1754944e-38, %v146_v34  ;;  %vm145_vm9 = vcmp.eq.f32.partialorder %v144_v36, 8.507059e+37 }
 0x18d   :  { %v84_v24 = vmul.f32 %v188_v19, %v83_v22 }
 0x18f   :  { %v85_v26 = vadd.f32 %v188_v19, %v84_v24 }
 0x190   :  { %v190_v27 = vpop.eup %189 }
 0x191   :  { %v89_v29 = vsel %vm88_vm4, %v188_v19, %v85_v26  ;;  %v136_v30 = vmul.f32 %v190_v27, %v134_v21  ;;  %vm141_vm6 = vweird.f32 %v190_v27 }
 0x192   :  { %v94_v31 = vsel %vm91_vm5, %v93_v28, %v89_v29  ;;  %vm142_vm8 = vmor %vm140_vm7, %vm141_vm6 }
 0x193   :  { %v95_v32 = vmul.f32 %v184_v13, %v94_v31  ;;  %v137_v33 = vsub.f32 1.0, %v136_v30 }
 0x195   :  { %96 = vst.msk [vmem:[#allocation7] sm:$0x1] %vm71_vm1, %v95_v32  ;;  %v138_v35 = vmul.f32 %v190_v27, %v137_v33 }
 0x197   :  { %v139_v37 = vadd.f32 %v190_v27, %v138_v35 }
 0x199   :  { %v143_v39 = vsel %vm142_vm8, %v190_v27, %v139_v37 }
 0x19a   :  { %v148_v40 = vsel %vm145_vm9, %v147_v38, %v143_v39 }
 0x19b   :  { %v149_v41 = vmul.f32 %v186_v16, %v148_v40 }
 0x19d   :  { %151 = vst.msk [vmem:[#allocation7 + $0x1] sm:$0x1] %vm71_vm1, %v149_v41 }
 0x19e   :  { %164 = dma.vmem_to_hbm [thread:$0]  %s157_s1, 32, %s159_s23, [#allocation4], %s274_s24, %s274_s24, %s275_s25  }
 0x19f   :  { %267 = dma.done.wait [#allocation4], 32  }
 0x1a0   :  { %268 = vsyncadd [#allocation4], 4294967264 }
 0x1a1   :  { %169 = vsyncpa [#allocation3], 1 }
 0x1a2   :  { %170 = vsyncpa [#allocation6], 1 }
 0x1a3   :  { %171 = vsyncpa [#allocation4], 1 }

</bundles_post_ra>
